<compile_context>
chip_gen: v7x
topology: tpu7x:2x2x1
jax: 0.10.0
libtpu: 0.0.40
codegen_flags: <defaults>
</compile_context>

<pallas_src>
import functools

import jax
import jax.numpy as jnp
from jax.experimental import pallas as pl
from jax.experimental.pallas import tpu as pltpu

_EPS = 1e-5  # torch nn.LayerNorm default


# --------------------------------------------------------------------------
# Kernel
# --------------------------------------------------------------------------
def _layernorm_kernel(x_ref, g_ref, b_ref, o_ref):
    # x_ref: (block_rows, D) tile in VMEM; g_ref/b_ref: (1, D) params.
    x = x_ref[...].astype(jnp.float32)
    d = x.shape[-1]
    r_d = jnp.float32(1.0 / d)  # hoisted 1/D (compile-time constant)

    # Single pass over the tile: sum(x) and sum(x*x); mean/var derived from
    # them.  All accumulation stays in f32.
    s1 = jnp.sum(x, axis=-1, keepdims=True)
    s2 = jnp.sum(x * x, axis=-1, keepdims=True)
    mean = s1 * r_d
    var = jnp.maximum(s2 * r_d - mean * mean, 0.0)
    inv = jax.lax.rsqrt(var + _EPS)

    g = g_ref[...].astype(jnp.float32)
    b = b_ref[...].astype(jnp.float32)
    # Fold gamma into the normalization scale: y = (x - mean) * (inv*g) + b.
    y = (x - mean) * (inv * g) + b
    o_ref[...] = y.astype(o_ref.dtype)


# --------------------------------------------------------------------------
# Tiling heuristics
# --------------------------------------------------------------------------
def _sublane_multiple(dtype):
    # Rows packed per sublane tile: f32 -> 8, bf16 -> 16, int8/fp8 -> 32.
    itemsize = jnp.dtype(dtype).itemsize
    return 8 * max(1, 4 // itemsize)


def _choose_block_rows(rows, d, dtype, vmem_budget_bytes=8 * 1024 * 1024):
    """Pick a row-tile keeping double-buffered in+out blocks under budget."""
    sub = _sublane_multiple(dtype)
    itemsize = jnp.dtype(dtype).itemsize
    # 2 pipeline buffers x (input + output) blocks.
    bytes_per_row = 2 * 2 * d * itemsize
    cap = max(sub, vmem_budget_bytes // bytes_per_row)
    target = min(rows, 1024, cap)
    if target >= rows:
        return rows  # whole thing fits in one block
    return max(sub, (target // sub) * sub)


# --------------------------------------------------------------------------
# Wrapper
# --------------------------------------------------------------------------
@functools.partial(jax.jit, static_argnames=("block_rows",))
def layernorm_pallas(x, gamma, beta, *, block_rows=None):
    """LayerNorm over the last axis of x (Pallas TPU kernel for D >= 128)."""
    orig_shape = x.shape
    d = orig_shape[-1]

    if d < 128:
        # Lane-sparse: do it inline in XLA instead of a wasteful Pallas call.
        xf = x.astype(jnp.float32)
        mean = jnp.mean(xf, axis=-1, keepdims=True)
        var = jnp.mean(jnp.square(xf - mean), axis=-1, keepdims=True)
        y = (xf - mean) * jax.lax.rsqrt(var + _EPS) * gamma.astype(
            jnp.float32
        ) + beta.astype(jnp.float32)
        return y.astype(x.dtype)

    x2 = x.reshape(-1, d)
    rows = x2.shape[0]
    if block_rows is None:
        block_rows = _choose_block_rows(rows, d, x.dtype)
    grid = (pl.cdiv(rows, block_rows),)  # partial tail block is clipped

    g2 = gamma.reshape(1, d)
    b2 = beta.reshape(1, d)

    out = pl.pallas_call(
        _layernorm_kernel,
        out_shape=jax.ShapeDtypeStruct((rows, d), x.dtype),
        grid_spec=pltpu.PrefetchScalarGridSpec(
            num_scalar_prefetch=0,
            grid=grid,
            in_specs=[
                pl.BlockSpec((block_rows, d), lambda i: (i, 0)),
                pl.BlockSpec((1, d), lambda i: (0, 0)),
                pl.BlockSpec((1, d), lambda i: (0, 0)),
            ],
            out_specs=pl.BlockSpec((block_rows, d), lambda i: (i, 0)),
        ),
        compiler_params=pltpu.CompilerParams(
            dimension_semantics=("parallel",),
        ),
    )(x2, g2, b2)
    return out.reshape(orig_shape)


class PreNorm:
    """JAX/Pallas equivalent of the PyTorch PreNorm module."""

    def __init__(self, dim, fn):
        # nn.LayerNorm(dim) parameters, default-initialized (weight=1, bias=0).
        self.gamma = jnp.ones((dim,), dtype=jnp.float32)
        self.beta = jnp.zeros((dim,), dtype=jnp.float32)
        self.fn = fn  # arbitrary injected sub-module (plain JAX callable)

    def __call__(self, x, **kwargs):
        normed = layernorm_pallas(x, self.gamma, self.beta)
        return self.fn(normed, **kwargs)


# --------------------------------------------------------------------------
# Demo / self-check
# --------------------------------------------------------------------------
def _ref_layernorm(x, gamma, beta):
    xf = x.astype(jnp.float32)
    mean = jnp.mean(xf, axis=-1, keepdims=True)
    var = jnp.mean(jnp.square(xf - mean), axis=-1, keepdims=True)
    return ((xf - mean) * jax.lax.rsqrt(var + _EPS) * gamma + beta).astype(x.dtype)


if __name__ == "__main__":
    key = jax.random.PRNGKey(0)
    B, S, D = 2, 8, 128  # lane-dense hidden dim -> exercises the Pallas path

    kx, kw, kb, kt = jax.random.split(key, 4)
    x = jax.random.normal(kx, (B, S, D), dtype=jnp.float32)

    # Deterministic example `fn`: a small linear D -> D (stands in for the
    # attention / feed-forward block PreNorm usually wraps).
    w = jax.random.normal(kw, (D, D), dtype=jnp.float32) * 0.02
    b = jax.random.normal(kb, (D,), dtype=jnp.float32) * 0.02
    fn = lambda y: jnp.dot(y, w) + b

    model = PreNorm(D, fn)
    out = jax.block_until_ready(model(x))
    ref = fn(_ref_layernorm(x, model.gamma, model.beta))
    assert out.shape == (B, S, D)
    assert jnp.max(jnp.abs(out - ref)) < 1e-4

    # Non-divisible row count + explicit small block -> exercises the
    # pl.cdiv grid with a clipped tail block.
    x_tail = jax.random.normal(kt, (3, 19, D), dtype=jnp.float32)
    out_tail = jax.block_until_ready(
        layernorm_pallas(x_tail, model.gamma, model.beta, block_rows=16)
    )
    ref_tail = _ref_layernorm(x_tail, model.gamma, model.beta)
    assert jnp.max(jnp.abs(out_tail - ref_tail)) < 1e-4

    # bf16 input: exercises the f32 accumulation path + 16-row sublane tiling.
    x_bf16 = jax.random.normal(kx, (4, 16, D), dtype=jnp.bfloat16)
    out_bf16 = jax.block_until_ready(
        layernorm_pallas(x_bf16, model.gamma, model.beta)
    )
    ref_bf16 = _ref_layernorm(x_bf16, model.gamma, model.beta)
    assert jnp.max(jnp.abs(out_bf16.astype(jnp.float32)
                           - ref_bf16.astype(jnp.float32))) < 2e-2

    # Small-D path (D < 128) runs inline in XLA (lane-sparse fallback).
    x_small = jax.random.normal(kx, (2, 8, 32), dtype=jnp.float32)
    g_small = jnp.ones((32,), jnp.float32)
    b_small = jnp.zeros((32,), jnp.float32)
    out_small = jax.block_until_ready(layernorm_pallas(x_small, g_small, b_small))
    ref_small = _ref_layernorm(x_small, g_small, b_small)
    assert jnp.max(jnp.abs(out_small - ref_small)) < 1e-4

    print("KERNEL_OK")
</pallas_src>

<mosaic_0001>
module attributes {stable_mosaic.version = 11 : i64} {
  func.func @_layernorm_kernel(%arg0: i32, %arg1: memref<16x128xf32, #tpu.memory_space<vmem>>, %arg2: memref<1x128xf32, #tpu.memory_space<vmem>>, %arg3: memref<1x128xf32, #tpu.memory_space<vmem>>, %arg4: memref<16x128xf32, #tpu.memory_space<vmem>>) attributes {dimension_semantics = [#tpu.dimension_semantics<parallel>], iteration_bounds = array<i64: 1>, scalar_prefetch = 0 : i64, scratch_operands = 0 : i64, tpu.core_type = #tpu.core_type<tc>, window_params = [{transform_indices = @transform_0, window_bounds = array<i64: 16, 128>}, {pipeline_mode = #tpu.pipeline_mode<synchronous>, transform_indices = @transform_1, window_bounds = array<i64: 1, 128>}, {pipeline_mode = #tpu.pipeline_mode<synchronous>, transform_indices = @transform_2, window_bounds = array<i64: 1, 128>}, {transform_indices = @transform_3, window_bounds = array<i64: 16, 128>}]} {
    %c0 = arith.constant 0 : index
    %c0_0 = arith.constant 0 : index
    %0 = vector.load %arg1[%c0, %c0_0] : memref<16x128xf32, #tpu.memory_space<vmem>>, vector<16x128xf32>
    %cst = arith.constant dense<0.000000e+00> : vector<16xf32>
    %1 = vector.multi_reduction <add>, %0, %cst [1] : vector<16x128xf32> to vector<16xf32>
    %2 = vector.shape_cast %1 : vector<16xf32> to vector<16x1xf32>
    %3 = arith.mulf %0, %0 : vector<16x128xf32>
    %cst_1 = arith.constant dense<0.000000e+00> : vector<16xf32>
    %4 = vector.multi_reduction <add>, %3, %cst_1 [1] : vector<16x128xf32> to vector<16xf32>
    %5 = vector.shape_cast %4 : vector<16xf32> to vector<16x1xf32>
    %cst_2 = arith.constant 7.812500e-03 : f32
    %6 = vector.broadcast %cst_2 : f32 to vector<16x1xf32>
    %7 = arith.mulf %2, %6 : vector<16x1xf32>
    %cst_3 = arith.constant 7.812500e-03 : f32
    %8 = vector.broadcast %cst_3 : f32 to vector<16x1xf32>
    %9 = arith.mulf %5, %8 : vector<16x1xf32>
    %10 = arith.mulf %7, %7 : vector<16x1xf32>
    %11 = arith.subf %9, %10 : vector<16x1xf32>
    %cst_4 = arith.constant 0.000000e+00 : f32
    %12 = vector.broadcast %cst_4 : f32 to vector<16x1xf32>
    %13 = arith.maximumf %11, %12 : vector<16x1xf32>
    %cst_5 = arith.constant 9.99999974E-6 : f32
    %14 = vector.broadcast %cst_5 : f32 to vector<16x1xf32>
    %15 = arith.addf %13, %14 : vector<16x1xf32>
    %16 = math.rsqrt %15 : vector<16x1xf32>
    %c0_6 = arith.constant 0 : index
    %c0_7 = arith.constant 0 : index
    %17 = vector.load %arg2[%c0_6, %c0_7] : memref<1x128xf32, #tpu.memory_space<vmem>>, vector<1x128xf32>
    %c0_8 = arith.constant 0 : index
    %c0_9 = arith.constant 0 : index
    %18 = vector.load %arg3[%c0_8, %c0_9] : memref<1x128xf32, #tpu.memory_space<vmem>>, vector<1x128xf32>
    %19 = vector.broadcast %7 : vector<16x1xf32> to vector<16x128xf32>
    %20 = arith.subf %0, %19 : vector<16x128xf32>
    %21 = vector.broadcast %16 : vector<16x1xf32> to vector<16x128xf32>
    %22 = vector.broadcast %17 : vector<1x128xf32> to vector<16x128xf32>
    %23 = arith.mulf %21, %22 : vector<16x128xf32>
    %24 = arith.mulf %20, %23 : vector<16x128xf32>
    %25 = vector.broadcast %18 : vector<1x128xf32> to vector<16x128xf32>
    %26 = arith.addf %24, %25 : vector<16x128xf32>
    %c0_10 = arith.constant 0 : index
    %c0_11 = arith.constant 0 : index
    %27 = vector.load %arg4[%c0_10, %c0_11] : memref<16x128xf32, #tpu.memory_space<vmem>>, vector<16x128xf32>
    tpu.vector_store %arg4[%c0_10, %c0_11], %26 {strides = array<i32>} : memref<16x128xf32, #tpu.memory_space<vmem>>, vector<16x128xf32>,
    return
  }
  func.func @transform_0(%arg0: i32) -> (i32, i32) {
    %c0_i32 = arith.constant 0 : i32
    %c0_i32_0 = arith.constant 0 : i32
    return %arg0, %c0_i32 : i32, i32
  }
  func.func @transform_1(%arg0: i32) -> (i32, i32) {
    %c0_i32 = arith.constant 0 : i32
    %c0_i32_0 = arith.constant 0 : i32
    %c0_i32_1 = arith.constant 0 : i32
    return %c0_i32, %c0_i32_0 : i32, i32
  }
  func.func @transform_2(%arg0: i32) -> (i32, i32) {
    %c0_i32 = arith.constant 0 : i32
    %c0_i32_0 = arith.constant 0 : i32
    %c0_i32_1 = arith.constant 0 : i32
    return %c0_i32, %c0_i32_0 : i32, i32
  }
  func.func @transform_3(%arg0: i32) -> (i32, i32) {
    %c0_i32 = arith.constant 0 : i32
    %c0_i32_0 = arith.constant 0 : i32
    return %arg0, %c0_i32 : i32, i32
  }
}

</mosaic_0001>

<bundles_post_ra>
// kernel: layernorm_pallas.1
= control target key start
LH: loop header
LB: loop body
LE: loop exit
PB: predicated region body
PF: predicated region fallthrough
CT: control target
= control target key end

     0   :  { %8 = vsyncpa [#allocation3], 0  ;;  %s214_s0 = inlined_call_operand.hbm [shape: f32[16,128], index: 0, kind: input, shape index: {}]   ;;  %s215_s1 = inlined_call_operand.vmem [shape: f32[1,128], index: 1, kind: input, shape index: {}]   ;;  %s216_s2 = inlined_call_operand.vmem [shape: f32[1,128], index: 2, kind: input, shape index: {}]   ;;  %s217_s3 = inlined_call_operand.hbm [shape: f32[16,128], index: 3, kind: output, shape index: {}]  }
   0x1   :  { %9 = vsyncpa [#allocation4], 0  ;;  %s154_s12 = smov [#allocation2]   ;;  %s106_s16 = scalar_lea.hbm %s214_s0, 256 }
   0x2   :  { %s15_s13 = sshll.u32 %s154_s12, 4  ;;  %p107_p0 = scmp.ne.s32.totalorder %s214_s0, %s106_s16  ;;  %s16_s13 = int_to_ptr.vmem [resolvable:$true] %s15_s13 }
   0x3   :  { %p110_p1 = scmp.lt.u32.totalorder %s106_s16, %s214_s0 }
   0x5   :  { %p112_p2 = pnand %p110_p1, %p107_p0 }
   0x7   :  { %115 = shalt.err (!%p112_p2)
}
   0x8   :  { %s116_s21 = scalar_lea.vmem %s16_s13, 256  ;;  %p121_p4 = scmp.lt.s32.totalorder %s16_s13, %s16_s13 }
   0x9   :  { %p117_p3 = scmp.ne.s32.totalorder %s16_s13, %s116_s21  ;;  %p122_p5 = scmp.lt.s32.totalorder %s116_s21, %s116_s21 }
   0xb   :  { %p123_p6 = por %p122_p5, %p121_p4 }
   0xd   :  { %p124_p7 = pnand %p123_p6, %p117_p3 }
   0xf   :  { %127 = shalt.err (!%p124_p7)
}
  0x10   :  { %s155_s22 = smov 128   ;;  %s156_s23 = smov 8  }
  0x11   :  { %21 = dma.hbm_to_vmem [thread:$0]  %s214_s0, 256, %s16_s13, [#allocation3], %s155_s22, %s155_s22, %s156_s23  }
  0x12   :  { %150 = dma.done.wait [#allocation3], 256  }
  0x13   :  { %151 = vsyncadd [#allocation3], 4294967040  ;;  %v29_v0 = vld [vmem:[#allocation2] sm:$0xff]  ;;  %v30_v1 = vld [vmem:[#allocation2 + $0x8] sm:$0xff]  ;;  %s157_s29 = smov [#allocation5]  }
  0x14   :  { %31 = vadd.xlane.f32.xlu0 %v29_v0  ;;  %v35_v2 = vmul.f32 %v29_v0, %v29_v0  ;;  %v36_v3 = vmul.f32 %v30_v1, %v30_v1  ;;  %v96_v20 = vld [vmem:[%s215_s1] ss:$0 sm:$0xff]  ;;  %s84_s30 = sshll.u32 %s157_s29, 4  ;;  %s85_s30 = int_to_ptr.vmem [resolvable:$true] %s84_s30 }
  0x15   :  { %v97_v24 = vld [vmem:[%s216_s2] ss:$0 sm:$0xff]  ;;  %s128_s1 = scalar_lea.vmem %s85_s30, 256  ;;  %p133_p9 = scmp.lt.s32.totalorder %s85_s30, %s85_s30 }
  0x16   :  { %37 = vadd.xlane.f32.xlu1 %v35_v2  ;;  %p129_p8 = scmp.ne.s32.totalorder %s85_s30, %s128_s1  ;;  %p134_p10 = scmp.lt.s32.totalorder %s128_s1, %s128_s1 }
  0x18   :  { %33 = vadd.xlane.f32.xlu0 %v30_v1  ;;  %p135_p11 = por %p134_p10, %p133_p9 }
  0x1a   :  { %39 = vadd.xlane.f32.xlu1 %v36_v3  ;;  %p136_p12 = pnand %p135_p11, %p129_p8 }
  0xa1   :  { %v32_v4 = vpop.xlane.xlu0 %31 }
  0xa2   :  { %v41_v5 = vmul.f32 0.0078125, %v32_v4 }
  0xa3   :  { %v38_v6 = vpop.xlane.xlu1 %37 }
  0xa4   :  { %v45_v7 = vmul.f32 %v41_v5, %v41_v5  ;;  %v43_v8 = vmul.f32 0.0078125, %v38_v6  ;;  %v57_v22 = vsub.f32 %v29_v0, %v41_v5 }
  0xa5   :  { %v34_v9 = vpop.xlane.xlu0 %33 }
  0xa6   :  { %v47_v10 = vsub.f32 %v43_v8, %v45_v7  ;;  %v42_v11 = vmul.f32 0.0078125, %v34_v9 }
  0xa7   :  { %v40_v12 = vpop.xlane.xlu1 %39 }
  0xa8   :  { %v49_v13 = vmax.f32 %v47_v10, 0.0  ;;  %v46_v14 = vmul.f32 %v42_v11, %v42_v11  ;;  %v44_v15 = vmul.f32 0.0078125, %v40_v12  ;;  %v58_v27 = vsub.f32 %v30_v1, %v42_v11 }
  0xaa   :  { %v51_v16 = vadd.f32 1e-05, %v49_v13  ;;  %v48_v17 = vsub.f32 %v44_v15, %v46_v14 }
  0xac   :  { %102 = vrsqrt.f32 %v51_v16  ;;  %v50_v18 = vmax.f32 %v48_v17, 0.0 }
  0xae   :  { %v52_v19 = vadd.f32 1e-05, %v50_v18 }
  0xb0   :  { %104 = vrsqrt.f32 %v52_v19 }
  0xb6   :  { %v103_v21 = vpop.eup %102 }
  0xb7   :  { %v65_v23 = vmul.f32 %v103_v21, %v96_v20 }
  0xb9   :  { %v67_v25 = vmul.f32 %v65_v23, %v57_v22 }
  0xba   :  { %v105_v26 = vpop.eup %104 }
  0xbb   :  { %v66_v28 = vmul.f32 %v105_v26, %v96_v20  ;;  %v75_v29 = vadd.f32 %v97_v24, %v67_v25 }
  0xbd   :  { %v68_v30 = vmul.f32 %v66_v28, %v58_v27  ;;  %77 = vst [vmem:[#allocation5] sm:$0xff] %v75_v29 }
  0xbf   :  { %v76_v31 = vadd.f32 %v97_v24, %v68_v30 }
  0xc1   :  { %78 = vst [vmem:[#allocation5 + $0x8] sm:$0xff] %v76_v31 }
  0xc2   :  { %139 = shalt.err (!%p136_p12)
}
  0xc3   :  { %s140_s5 = scalar_lea.hbm %s217_s3, 256 }
  0xc4   :  { %p141_p13 = scmp.ne.s32.totalorder %s217_s3, %s140_s5  ;;  %p144_p0 = scmp.lt.u32.totalorder %s140_s5, %s217_s3 }
  0xc6   :  { %p146_p1 = pnand %p144_p0, %p141_p13 }
  0xc8   :  { %149 = shalt.err (!%p146_p1)
}
  0xc9   :  { %90 = dma.vmem_to_hbm [thread:$0]  %s85_s30, 256, %s217_s3, [#allocation4], %s155_s22, %s155_s22, %s156_s23  }
  0xca   :  { %152 = dma.done.wait [#allocation4], 256  }
  0xcb   :  { %153 = vsyncadd [#allocation4], 4294967040 }
  0xcc   :  { %94 = vsyncpa [#allocation3], 1 }
  0xcd   :  { %95 = vsyncpa [#allocation4], 1 }

</bundles_post_ra>
